<compile_context>
chip_gen: v6e
topology: v6e:2x2x1
jax: 0.10.0
libtpu: 0.0.40
codegen_flags: <defaults>
</compile_context>

<pallas_src>
import functools

import jax
import jax.numpy as jnp
from jax.experimental import pallas as pl
from jax.experimental.pallas import tpu as pltpu


# Per-grid-step VMEM budget for the streamed blocks (double-buffered input +
# output + possible f32 reduce temp).  HBM roofline saturates around 1-2 MiB
# per buffer, so bigger blocks buy nothing.
_DEFAULT_STEP_BUDGET = 8 * 1024 * 1024


def _vmem_capacity_bytes() -> int:
    """Physical VMEM of the current chip (v5e/v6e: 128 MiB, v7x: 64 MiB)."""
    try:
        return int(pltpu.get_tpu_info().vmem_capacity_bytes)
    except Exception:
        return 64 * 1024 * 1024  # conservative (v7x) fallback


# ---------------------------------------------------------------------------
# Fused path: one HBM pass over x.  Block = (TB, C, HW); squeeze + excite MLP
# + scale all inside one grid step.
# ---------------------------------------------------------------------------
def _se_fused_kernel(x_ref, w1t_ref, b1_ref, w2t_ref, b2_ref, o_ref):
    # x_ref : (TB, C, HW) native dtype
    # w1t   : (C, Cr) f32 (already scaled by 1/HW)   b1 : (1, Cr)
    # w2t   : (Cr, C) f32                            b2 : (1, C)
    x = x_ref[...]

    # Squeeze: raw spatial sum accumulated in f32 (1/HW folded into w1t).
    pooled = jnp.sum(x.astype(jnp.float32), axis=-1)                # (TB, C)

    # Excite: Linear -> ReLU -> Linear -> Sigmoid (tiny, f32).
    h = jnp.dot(pooled, w1t_ref[...],
                preferred_element_type=jnp.float32) + b1_ref[...]   # (TB, Cr)
    h = jnp.maximum(h, 0.0)
    y = jnp.dot(h, w2t_ref[...],
                preferred_element_type=jnp.float32) + b2_ref[...]   # (TB, C)
    y = jax.nn.sigmoid(y)

    # Scale: cast the small gate to the streaming dtype; the big tile is
    # never upcast for the broadcast multiply.
    o_ref[...] = x * y.astype(o_ref.dtype)[:, :, None]


def _se_fused(x_flat, w1_t, b1_2d, w2_t, b2_2d, *, budget, row_cost, vmem_cap):
    B, C, HW = x_flat.shape
    Cr = w1_t.shape[1]
    dsize = jnp.dtype(x_flat.dtype).itemsize

    # Batch rows per grid step under the VMEM budget.
    tb_fit = max(1, budget // row_cost)
    # Deep enough grid for DMA/compute overlap: >= 4 steps when B allows.
    target_steps = min(B, 4)
    TB = max(1, min(tb_fit, pl.cdiv(B, target_steps)))
    n_steps = pl.cdiv(B, TB)
    # Prefer an even step count so the "parallel" batch axis splits evenly
    # across v7x's two TensorCores (shrinking TB never hurts VMEM).
    if n_steps > 1 and n_steps % 2:
        for cand in range(TB - 1, 0, -1):
            if pl.cdiv(B, cand) % 2 == 0:
                TB, n_steps = cand, pl.cdiv(B, cand)
                break

    vmem_limit = int(min(vmem_cap,
                         max(32 * 1024 * 1024,
                             TB * row_cost + 8 * 1024 * 1024)))

    cost = pl.CostEstimate(
        flops=int(4 * B * C * HW + 4 * B * C * Cr),
        transcendentals=int(B * C),
        bytes_accessed=int(2 * B * C * HW * dsize + 8 * C * Cr + 4 * (C + Cr)),
    )

    return pl.pallas_call(
        _se_fused_kernel,
        out_shape=jax.ShapeDtypeStruct((B, C, HW), x_flat.dtype),
        grid_spec=pltpu.PrefetchScalarGridSpec(
            num_scalar_prefetch=0,
            grid=(n_steps,),
            in_specs=[
                pl.BlockSpec((TB, C, HW), lambda i: (i, 0, 0)),
                pl.BlockSpec((C, Cr), lambda i: (0, 0)),
                pl.BlockSpec((1, Cr), lambda i: (0, 0)),
                pl.BlockSpec((Cr, C), lambda i: (0, 0)),
                pl.BlockSpec((1, C), lambda i: (0, 0)),
            ],
            out_specs=pl.BlockSpec((TB, C, HW), lambda i: (i, 0, 0)),
        ),
        compiler_params=pltpu.CompilerParams(
            dimension_semantics=("parallel",),
            vmem_limit_bytes=vmem_limit),
        cost_estimate=cost,
    )(x_flat, w1_t, b1_2d, w2_t, b2_2d)


# ---------------------------------------------------------------------------
# Chunked fallback: a single batch row does not fit in VMEM.
# Pass 1 streams HW chunks, accumulates the pooled sum in scratch and emits
# the (B, C, 1) gate; pass 2 re-streams x applying the gate.
# ---------------------------------------------------------------------------
def _se_pool_gate_kernel(x_ref, w1t_ref, b1_ref, w2t_ref, b2_ref,
                         gate_ref, acc_ref, *, hw_total):
    c = pl.program_id(1)

    @pl.when(c == 0)
    def _():
        acc_ref[...] = jnp.zeros_like(acc_ref)

    x = x_ref[...]                                    # (1, C, HWC)
    hwc = x.shape[-1]
    if hw_total % hwc:
        # Final chunk is partial: zero the out-of-range tail lanes before
        # accumulating (their VMEM contents are undefined).
        lane = jax.lax.broadcasted_iota(jnp.int32, x.shape, 2) + c * hwc
        xf = jnp.where(lane < hw_total, x.astype(jnp.float32), 0.0)
    else:
        xf = x.astype(jnp.float32)
    acc_ref[...] += jnp.sum(xf, axis=-1)              # (1, C)

    @pl.when(c == pl.num_programs(1) - 1)
    def _():
        pooled = acc_ref[...]
        h = jnp.dot(pooled, w1t_ref[...],
                    preferred_element_type=jnp.float32) + b1_ref[...]
        h = jnp.maximum(h, 0.0)
        y = jnp.dot(h, w2t_ref[...],
                    preferred_element_type=jnp.float32) + b2_ref[...]
        gate_ref[...] = jax.nn.sigmoid(y)[:, :, None]


def _se_scale_kernel(x_ref, gate_ref, o_ref):
    o_ref[...] = x_ref[...] * gate_ref[...].astype(o_ref.dtype)


def _se_chunked(x_flat, w1_t, b1_2d, w2_t, b2_2d, *, budget, vmem_cap):
    B, C, HW = x_flat.shape
    Cr = w1_t.shape[1]
    dsize = jnp.dtype(x_flat.dtype).itemsize

    # HW chunk size: per-step VMEM ~= C*HWC*(4*dsize + 4)  (double-buffered
    # in/out for the scale pass, f32 reduce temp for the pooling pass).
    per_elem = C * (4 * dsize + 4)
    HWC = max(128, (budget // per_elem) // 128 * 128)
    if HWC >= HW:
        HWC = HW
    n_chunks = pl.cdiv(HW, HWC)

    vmem_limit = int(min(vmem_cap,
                         max(32 * 1024 * 1024,
                             per_elem * HWC + 8 * 1024 * 1024)))

    pool_cost = pl.CostEstimate(
        flops=int(2 * B * C * HW + 4 * B * C * Cr),
        transcendentals=int(B * C),
        bytes_accessed=int(B * C * HW * dsize + 4 * B * C),
    )
    scale_cost = pl.CostEstimate(
        flops=int(B * C * HW),
        transcendentals=0,
        bytes_accessed=int(2 * B * C * HW * dsize + 4 * B * C),
    )

    # Pass 1: pooled sum over HW chunks -> excite MLP -> gate (B, C, 1) f32.
    gate = pl.pallas_call(
        functools.partial(_se_pool_gate_kernel, hw_total=HW),
        out_shape=jax.ShapeDtypeStruct((B, C, 1), jnp.float32),
        grid_spec=pltpu.PrefetchScalarGridSpec(
            num_scalar_prefetch=0,
            grid=(B, n_chunks),
            in_specs=[
                pl.BlockSpec((1, C, HWC), lambda i, c: (i, 0, c)),
                pl.BlockSpec((C, Cr), lambda i, c: (0, 0)),
                pl.BlockSpec((1, Cr), lambda i, c: (0, 0)),
                pl.BlockSpec((Cr, C), lambda i, c: (0, 0)),
                pl.BlockSpec((1, C), lambda i, c: (0, 0)),
            ],
            out_specs=pl.BlockSpec((1, C, 1), lambda i, c: (i, 0, 0)),
            scratch_shapes=[pltpu.VMEM((1, C), jnp.float32)],
        ),
        compiler_params=pltpu.CompilerParams(
            dimension_semantics=("parallel", "arbitrary"),
            vmem_limit_bytes=vmem_limit),
        cost_estimate=pool_cost,
    )(x_flat, w1_t, b1_2d, w2_t, b2_2d)

    # Pass 2: re-stream x applying the gate (both grid axes independent).
    out_flat = pl.pallas_call(
        _se_scale_kernel,
        out_shape=jax.ShapeDtypeStruct((B, C, HW), x_flat.dtype),
        grid_spec=pltpu.PrefetchScalarGridSpec(
            num_scalar_prefetch=0,
            grid=(B, n_chunks),
            in_specs=[
                pl.BlockSpec((1, C, HWC), lambda i, c: (i, 0, c)),
                pl.BlockSpec((1, C, 1), lambda i, c: (i, 0, 0)),
            ],
            out_specs=pl.BlockSpec((1, C, HWC), lambda i, c: (i, 0, c)),
        ),
        compiler_params=pltpu.CompilerParams(
            dimension_semantics=("parallel", "parallel"),
            vmem_limit_bytes=vmem_limit),
        cost_estimate=scale_cost,
    )(x_flat, gate)
    return out_flat


# ---------------------------------------------------------------------------
# Public wrapper
# ---------------------------------------------------------------------------
@functools.partial(jax.jit, static_argnames=("step_vmem_budget",))
def se_layer(x, w1, b1, w2, b2, *, step_vmem_budget=None):
    """SELayer forward.

    x  : (B, C, H, W)
    w1 : (C//r, C)   b1 : (C//r,)    -- first Linear (PyTorch layout)
    w2 : (C, C//r)   b2 : (C,)       -- second Linear (PyTorch layout)
    step_vmem_budget: optional per-grid-step VMEM budget in bytes (mainly to
        force/test the chunked fallback on small shapes).
    """
    B, C, H, W = x.shape
    Cr = w1.shape[0]
    HW = H * W
    dsize = jnp.dtype(x.dtype).itemsize

    budget = (_DEFAULT_STEP_BUDGET if step_vmem_budget is None
              else int(step_vmem_budget))
    vmem_cap = _vmem_capacity_bytes()

    # Fold 1/HW into the first Linear and pre-transpose so the kernel does
    # plain (rows @ matrix) matmuls on resident f32 weights.
    w1_t = (w1.T * (1.0 / HW)).astype(jnp.float32)       # (C, Cr)
    w2_t = w2.T.astype(jnp.float32)                      # (Cr, C)
    b1_2d = b1.reshape(1, Cr).astype(jnp.float32)
    b2_2d = b2.reshape(1, C).astype(jnp.float32)

    x_flat = x.reshape(B, C, HW)                         # free reshape

    # Per-batch-row VMEM cost of the fused kernel: double-buffered input and
    # output blocks plus the f32 temp the pooled-sum upcast may materialize.
    row_cost = 4 * C * HW * dsize + C * HW * 4
    fused_limit = (budget if step_vmem_budget is not None
                   else min(vmem_cap // 2, 40 * 1024 * 1024))

    if row_cost <= fused_limit:
        out_flat = _se_fused(x_flat, w1_t, b1_2d, w2_t, b2_2d,
                             budget=budget, row_cost=row_cost,
                             vmem_cap=vmem_cap)
    else:
        out_flat = _se_chunked(x_flat, w1_t, b1_2d, w2_t, b2_2d,
                               budget=budget, vmem_cap=vmem_cap)

    return out_flat.reshape(B, C, H, W)


def _reference(x, w1, b1, w2, b2):
    """Pure-JAX reference mirroring the PyTorch forward."""
    y = jnp.mean(x.astype(jnp.float32), axis=(2, 3))               # (B, C)
    y = jnp.maximum(y @ w1.T + b1, 0.0)                            # (B, C//r)
    y = jax.nn.sigmoid(y @ w2.T + b2)                              # (B, C)
    return (x.astype(jnp.float32) * y[:, :, None, None]).astype(x.dtype)


if __name__ == "__main__":
    key = jax.random.PRNGKey(0)

    def make_params(kp, C, reduction):
        Cr = max(1, C // reduction)
        k1, k2, k3, k4 = jax.random.split(kp, 4)
        w1 = jax.random.normal(k1, (Cr, C), dtype=jnp.float32) * 0.1
        b1 = jax.random.normal(k2, (Cr,), dtype=jnp.float32) * 0.1
        w2 = jax.random.normal(k3, (C, Cr), dtype=jnp.float32) * 0.1
        b2 = jax.random.normal(k4, (C,), dtype=jnp.float32) * 0.1
        return w1, b1, w2, b2

    # (B, C, H, W, reduction, forced step_vmem_budget):
    #   1) lane-dense HW=256, 4 grid steps
    #   2) ragged HW=49 (full-dim block, no padding, masked stores)
    #   3) B=5 -> partial edge batch block
    #   4) tiny forced budget -> chunked fallback (multi-chunk + partial chunk)
    configs = [
        (4, 32, 16, 16, 16, None),
        (2, 64, 7, 7, 16, None),
        (5, 32, 16, 16, 16, None),
        (2, 64, 30, 30, 16, 256 * 1024),
    ]

    for idx, (B, C, H, W, reduction, forced_budget) in enumerate(configs):
        kx, kp = jax.random.split(jax.random.fold_in(key, idx))
        x = jax.random.normal(kx, (B, C, H, W), dtype=jnp.float32)
        w1, b1, w2, b2 = make_params(kp, C, reduction)

        out = jax.block_until_ready(
            se_layer(x, w1, b1, w2, b2, step_vmem_budget=forced_budget))
        ref = _reference(x, w1, b1, w2, b2)

        assert out.shape == (B, C, H, W)
        assert jnp.allclose(out, ref, atol=1e-5, rtol=1e-5), \
            f"mismatch vs reference for config {idx}"

    print("KERNEL_OK")
</pallas_src>

<mosaic_0001>
module attributes {stable_mosaic.version = 11 : i64} {
  func.func @_se_fused_kernel(%arg0: i32, %arg1: memref<1x32x256xf32, #tpu.memory_space<vmem>>, %arg2: memref<32x2xf32, #tpu.memory_space<vmem>>, %arg3: memref<1x2xf32, #tpu.memory_space<vmem>>, %arg4: memref<2x32xf32, #tpu.memory_space<vmem>>, %arg5: memref<1x32xf32, #tpu.memory_space<vmem>>, %arg6: memref<1x32x256xf32, #tpu.memory_space<vmem>>) attributes {dimension_semantics = [#tpu.dimension_semantics<parallel>], iteration_bounds = array<i64: 4>, scalar_prefetch = 0 : i64, scratch_operands = 0 : i64, tpu.core_type = #tpu.core_type<tc>, window_params = [{transform_indices = @transform_0, window_bounds = array<i64: 1, 32, 256>}, {pipeline_mode = #tpu.pipeline_mode<synchronous>, transform_indices = @transform_1, window_bounds = array<i64: 32, 2>}, {pipeline_mode = #tpu.pipeline_mode<synchronous>, transform_indices = @transform_2, window_bounds = array<i64: 1, 2>}, {pipeline_mode = #tpu.pipeline_mode<synchronous>, transform_indices = @transform_3, window_bounds = array<i64: 2, 32>}, {pipeline_mode = #tpu.pipeline_mode<synchronous>, transform_indices = @transform_4, window_bounds = array<i64: 1, 32>}, {transform_indices = @transform_5, window_bounds = array<i64: 1, 32, 256>}]} {
    %c0 = arith.constant 0 : index
    %c0_0 = arith.constant 0 : index
    %c0_1 = arith.constant 0 : index
    %0 = vector.load %arg1[%c0, %c0_0, %c0_1] : memref<1x32x256xf32, #tpu.memory_space<vmem>>, vector<1x32x256xf32>
    %cst = arith.constant dense<0.000000e+00> : vector<1x32xf32>
    %1 = vector.multi_reduction <add>, %0, %cst [2] : vector<1x32x256xf32> to vector<1x32xf32>
    %c0_2 = arith.constant 0 : index
    %c0_3 = arith.constant 0 : index
    %2 = vector.load %arg2[%c0_2, %c0_3] : memref<32x2xf32, #tpu.memory_space<vmem>>, vector<32x2xf32>
    %cst_4 = arith.constant dense<0.000000e+00> : vector<1x2xf32>
    %3 = tpu.matmul %1, %2, %cst_4 {dimension_numbers = #tpu.dot_dimension_numbers<[1], [0], [0], [1], [0, 0, 1, 1], [], []>} : vector<1x32xf32>, vector<32x2xf32>, vector<1x2xf32> -> vector<1x2xf32>
    %c0_5 = arith.constant 0 : index
    %c0_6 = arith.constant 0 : index
    %4 = vector.load %arg3[%c0_5, %c0_6] : memref<1x2xf32, #tpu.memory_space<vmem>>, vector<1x2xf32>
    %5 = arith.addf %3, %4 : vector<1x2xf32>
    %cst_7 = arith.constant 0.000000e+00 : f32
    %6 = vector.broadcast %cst_7 : f32 to vector<1x2xf32>
    %7 = arith.maximumf %5, %6 : vector<1x2xf32>
    %c0_8 = arith.constant 0 : index
    %c0_9 = arith.constant 0 : index
    %8 = vector.load %arg4[%c0_8, %c0_9] : memref<2x32xf32, #tpu.memory_space<vmem>>, vector<2x32xf32>
    %cst_10 = arith.constant dense<0.000000e+00> : vector<1x32xf32>
    %9 = tpu.matmul %7, %8, %cst_10 {dimension_numbers = #tpu.dot_dimension_numbers<[1], [0], [0], [1], [0, 0, 1, 1], [], []>} : vector<1x2xf32>, vector<2x32xf32>, vector<1x32xf32> -> vector<1x32xf32>
    %c0_11 = arith.constant 0 : index
    %c0_12 = arith.constant 0 : index
    %10 = vector.load %arg5[%c0_11, %c0_12] : memref<1x32xf32, #tpu.memory_space<vmem>>, vector<1x32xf32>
    %11 = arith.addf %9, %10 : vector<1x32xf32>
    %12 = arith.negf %11 : vector<1x32xf32>
    %13 = math.exp %12 : vector<1x32xf32>
    %cst_13 = arith.constant 1.000000e+00 : f32
    %14 = vector.broadcast %cst_13 : f32 to vector<1x32xf32>
    %15 = arith.addf %14, %13 : vector<1x32xf32>
    %16 = arith.divf %14, %15 : vector<1x32xf32>
    %17 = vector.shape_cast %16 : vector<1x32xf32> to vector<1x32x1xf32>
    %18 = vector.broadcast %17 : vector<1x32x1xf32> to vector<1x32x256xf32>
    %19 = arith.mulf %0, %18 : vector<1x32x256xf32>
    %c0_14 = arith.constant 0 : index
    %c0_15 = arith.constant 0 : index
    %c0_16 = arith.constant 0 : index
    %20 = vector.load %arg6[%c0_14, %c0_15, %c0_16] : memref<1x32x256xf32, #tpu.memory_space<vmem>>, vector<1x32x256xf32>
    tpu.vector_store %arg6[%c0_14, %c0_15, %c0_16], %19 {strides = array<i32>} : memref<1x32x256xf32, #tpu.memory_space<vmem>>, vector<1x32x256xf32>,
    return
  }
  func.func @transform_0(%arg0: i32) -> (i32, i32, i32) {
    %c0_i32 = arith.constant 0 : i32
    %c0_i32_0 = arith.constant 0 : i32
    %c0_i32_1 = arith.constant 0 : i32
    return %arg0, %c0_i32, %c0_i32_0 : i32, i32, i32
  }
  func.func @transform_1(%arg0: i32) -> (i32, i32) {
    %c0_i32 = arith.constant 0 : i32
    %c0_i32_0 = arith.constant 0 : i32
    %c0_i32_1 = arith.constant 0 : i32
    return %c0_i32, %c0_i32_0 : i32, i32
  }
  func.func @transform_2(%arg0: i32) -> (i32, i32) {
    %c0_i32 = arith.constant 0 : i32
    %c0_i32_0 = arith.constant 0 : i32
    %c0_i32_1 = arith.constant 0 : i32
    return %c0_i32, %c0_i32_0 : i32, i32
  }
  func.func @transform_3(%arg0: i32) -> (i32, i32) {
    %c0_i32 = arith.constant 0 : i32
    %c0_i32_0 = arith.constant 0 : i32
    %c0_i32_1 = arith.constant 0 : i32
    return %c0_i32, %c0_i32_0 : i32, i32
  }
  func.func @transform_4(%arg0: i32) -> (i32, i32) {
    %c0_i32 = arith.constant 0 : i32
    %c0_i32_0 = arith.constant 0 : i32
    %c0_i32_1 = arith.constant 0 : i32
    return %c0_i32, %c0_i32_0 : i32, i32
  }
  func.func @transform_5(%arg0: i32) -> (i32, i32, i32) {
    %c0_i32 = arith.constant 0 : i32
    %c0_i32_0 = arith.constant 0 : i32
    %c0_i32_1 = arith.constant 0 : i32
    return %arg0, %c0_i32, %c0_i32_0 : i32, i32, i32
  }
}

</mosaic_0001>

<bundles_post_ra>
// kernel: se_layer.1
= control target key start
LH: loop header
LB: loop body
LE: loop exit
PB: predicated region body
PF: predicated region fallthrough
CT: control target
= control target key end

     0   :  { %s625_s18 = smov 0   ;;  %s702_s0 = inlined_call_operand.vmem [shape: f32[4,32,256], index: 0, kind: input, shape index: {}]   ;;  %s703_s1 = inlined_call_operand.vmem [shape: f32[32,2], index: 1, kind: input, shape index: {}]   ;;  %s704_s2 = inlined_call_operand.vmem [shape: f32[1,2], index: 2, kind: input, shape index: {}]   ;;  %s705_s3 = inlined_call_operand.vmem [shape: f32[2,32], index: 3, kind: input, shape index: {}]   ;;  %s706_s4 = inlined_call_operand.vmem [shape: f32[1,32], index: 4, kind: input, shape index: {}]   ;;  %s707_s5 = inlined_call_operand.vmem [shape: f32[4,32,256], index: 5, kind: output, shape index: {}]  }
   0x1 LB: > { %s531_s19 = sadd.s32 4294967295, %s591_s18   ;;  %p535_p0 = scmp.ge.s32.totalorder %s591_s18, 1  ;;  %s591_s18 = sphi %s625_s18, %s15_s18  }
   0x2   : > { %p187_p1 = scmp.lt.s32.totalorder %s591_s18, 5 }
   0x4   : > { %p188_p2 = pnand %p535_p0, %p187_p1 }
   0x5   : > { %p215_p3 = scmp.lt.s32.totalorder (!%p188_p2), %s531_s19, 3 }
   0x6   : > { %191 = sbr.rel (%p188_p2) target bundleno = 716 (0x2cc), region = 40 }
   0xb   : > { %s709_s19 = smov (!%p215_p3, %s531_s19), 3  ;;  %v593_v12 = vmov 0.0   ;;  %v248_v13 = vld [vmem:[%s703_s1 + $0x18] sm:$0xff]  ;;  %v247_v14 = vld [vmem:[%s703_s1 + $0x10] sm:$0xff]  ;;  %v246_v15 = vld [vmem:[%s703_s1 + $0x8] sm:$0xff]  ;;  %vm594_vm0 = vmmov 0   ;;  %v254_v17 = vlaneseq }
   0xc   : > { %s546_s20 = sshll.u32 %s709_s19, 6  ;;  %555 = vmatprep.subr.mxu0 %v593_v12  ;;  %566 = vmatprep.subr.mxu1 %v593_v12  ;;  %v245_v16 = vld [vmem:[%s703_s1] sm:$0xff]  ;;  %vm265_vm1 = vcmask 130112   ;;  %vm272_vm2 = vcmask 195712   ;;  %vm279_vm3 = vcmask 261312   ;;  %vm281_vm4 = vcmask 261120  }
   0xd   : > { %s219_s23 = scalar_lea.vmem %s702_s0, %s546_s20  ;;  %556 = vmatpush3.msra.mxu0 %v248_v13  ;;  %563 = vmatprep.mubr.msk.f32.mxu0 %vm594_vm0, %v593_v12  ;;  %v255_v18 = vand.u32 127, %v254_v17  ;;  %v257_v19 = vshrl.u32 %v254_v17, 7  ;;  %v355_v38 = vld [vmem:[%s705_s3] sm:$0x3]  ;;  %vm361_vm5 = vcmask 1041408   ;;  %vm357_vm6 = vcmask 15360   ;;  %s224_s15 = scalar_lea.vmem %s707_s5, %s546_s20 }
   0xe   : > { %v641_v0 = vld [vmem:[%s219_s23] sm:$0xff]  ;;  %v643_v1 = vld [vmem:[%s219_s23 + $0x8] sm:$0xff]  ;;  %v651_v5 = vld [vmem:[%s219_s23 + $0x10] sm:$0xff]  ;;  %557 = vmatprep.subr.mxu0 %v593_v12  ;;  %568 = vmatprep.mubr.msk.f32.mxu1 %vm594_vm0, %v593_v12 }
   0xf   : > { %v645_v2 = vld [vmem:[%s219_s23 + $0x20] sm:$0xff]  ;;  %v233_v3 = vadd.f32 %v643_v1, %v641_v0  ;;  %v649_v4 = vld [vmem:[%s219_s23 + $0x28] sm:$0xff]  ;;  %v653_v6 = vld [vmem:[%s219_s23 + $0x18] sm:$0xff]  ;;  %558 = vmatpush3.msra.mxu0 %v247_v14  ;;  %v260_v20 = vadd.s32 4294967288, %v255_v18  ;;  %v267_v21 = vadd.s32 4294967280, %v255_v18  ;;  %v274_v22 = vadd.s32 4294967272, %v255_v18  ;;  %567 = vmatpush3.msk.msra.mxu1 %vm361_vm5, %v355_v38 }
  0x10   : > { %v239_v7 = vadd.f32 %v649_v4, %v645_v2  ;;  %v657_v8 = vld [vmem:[%s219_s23 + $0x30] sm:$0xff]  ;;  %v659_v9 = vld [vmem:[%s219_s23 + $0x38] sm:$0xff]  ;;  %v236_v10 = vadd.f32 %v653_v6, %v651_v5  ;;  %559 = vmatprep.subr.mxu0 %v593_v12  ;;  %v258_v24 = vsub.s32 %v255_v18, %v257_v19  ;;  %v249_v39 = vld [vmem:[%s704_s2] sm:$0x1]  ;;  %v443_v51 = vsub.s32 0, %v257_v19 }
  0x11   : > { %234 = vadd.xlane.f32.xlu0 %v233_v3  ;;  %v242_v11 = vadd.f32 %v659_v9, %v657_v8  ;;  %560 = vmatpush3.msra.mxu0 %v246_v15  ;;  %v263_v26 = vsub.s32 %v260_v20, %v257_v19  ;;  %v270_v27 = vsub.s32 %v267_v21, %v257_v19  ;;  %v356_v44 = vld [vmem:[%s706_s4] sm:$0x1] }
  0x12   : > { %240 = vadd.xlane.f32.xlu1 %v239_v7  ;;  %561 = vmatprep.subr.mxu0 %v593_v12  ;;  %v277_v28 = vsub.s32 %v274_v22, %v257_v19 }
  0x13   : > { %562 = vmatpush3.msra.mxu0 %v245_v16 }
  0x15   : > { %237 = vadd.xlane.f32.xlu0 %v236_v10 }
  0x16   : > { %243 = vadd.xlane.f32.xlu1 %v242_v11 }
  0x9a   : > { %v235_v23 = vpop.xlane.xlu0 %234 }
  0x9b   : > { %v241_v25 = vpop.xlane.xlu1 %240  ;;  %v259_v30 = vrot.slane %v235_v23, %v258_v24 }
  0x9c   : > { %v271_v33 = vrot.slane %v241_v25, %v270_v27 }
  0x9e   : > { %v238_v29 = vpop.xlane.xlu0 %237 }
  0x9f   : > { %v264_v31 = vrot.slane %v238_v29, %v263_v26  ;;  %v244_v32 = vpop.xlane.xlu1 %243 }
  0xa0   : > { %v278_v34 = vrot.slane %v244_v32, %v277_v28 }
  0xa1   : > { %v266_v35 = vsel %vm265_vm1, %v264_v31, %v259_v30 }
  0xa2   : > { %v273_v36 = vsel %vm272_vm2, %v271_v33, %v266_v35 }
  0xa3   : > { %v280_v37 = vsel %vm279_vm3, %v278_v34, %v273_v36 }
  0xa4   : > { %564 = vmatmul.mubr.msk.f32.vlgmr.msra.gmra.mxu0 %vm281_vm4, %v280_v37 }
 0x164   : > { %v350_v40 = vpop.f32.mrf.mxu0 }
 0x165   : > { %v351_v41 = vadd.f32 %v350_v40, %v249_v39 }
 0x166   : > { %v565_v42 = vpop.f32.mrf.mxu0 }
 0x167   : > { %v354_v43 = vmax.f32 %v351_v41, 0.0 }
 0x169   : > { %569 = vmatmul.mubr.msk.f32.vlgmr.msra.gmra.mxu1 %vm357_vm6, %v354_v43 }
 0x229   : > { %v431_v45 = vpop.f32.mrf.mxu1 }
 0x22a   : > { %v432_v46 = vadd.f32 %v431_v45, %v356_v44 }
 0x22b   : > { %v570_v47 = vpop.f32.mrf.mxu1 }
 0x22c   : > { %v543_v48 = vmul.f32 -1.442695, %v432_v46 }
 0x22e   : > { %581 = vpow2.f32 %v543_v48 }
 0x23b   : > { %v582_v49 = vpop.eup %581 }
 0x23c   : > { %v438_v50 = vadd.f32 1.0, %v582_v49 }
 0x23e   : > { %583 = vrcp.f32 %v438_v50 }
 0x24b   : > { %v584_v52 = vpop.eup %583 }
 0x24c   : > { %v444_v53 = vrot.slane %v584_v52, %v443_v51 }
 0x24e   : > { %450 = vbcast.lane.b32.xlu1 %v444_v53, 264  ;;  %446 = vbcast.lane.b32.xlu0 %v444_v53, 256 }
 0x252   : > { %454 = vbcast.lane.b32.xlu1 %v444_v53, 272 }
 0x256   : > { %458 = vbcast.lane.b32.xlu1 %v444_v53, 280 }
 0x2c0   : > { %v451_v54 = vpop.permute.xlu1 %450  ;;  %v447_v55 = vpop.permute.xlu0 %446 }
 0x2c1   : > { %v462_v56 = vmul.f32 %v451_v54, %v651_v5  ;;  %v463_v57 = vmul.f32 %v451_v54, %v653_v6  ;;  %v460_v58 = vmul.f32 %v447_v55, %v641_v0  ;;  %v461_v59 = vmul.f32 %v447_v55, %v643_v1 }
 0x2c3   : > { %470 = vst [vmem:[%s224_s15 + $0x10] sm:$0xff] %v462_v56  ;;  %471 = vst [vmem:[%s224_s15 + $0x18] sm:$0xff] %v463_v57 }
 0x2c4   : > { %468 = vst [vmem:[%s224_s15] sm:$0xff] %v460_v58  ;;  %469 = vst [vmem:[%s224_s15 + $0x8] sm:$0xff] %v461_v59  ;;  %v455_v60 = vpop.permute.xlu1 %454 }
 0x2c5   : > { %v464_v61 = vmul.f32 %v455_v60, %v645_v2  ;;  %v465_v62 = vmul.f32 %v455_v60, %v649_v4 }
 0x2c7   : > { %472 = vst [vmem:[%s224_s15 + $0x20] sm:$0xff] %v464_v61  ;;  %473 = vst [vmem:[%s224_s15 + $0x28] sm:$0xff] %v465_v62 }
 0x2c8   : > { %v459_v63 = vpop.permute.xlu1 %458 }
 0x2c9   : > { %v466_v3 = vmul.f32 %v459_v63, %v657_v8  ;;  %v467_v5 = vmul.f32 %v459_v63, %v659_v9 }
 0x2cb   : > { %474 = vst [vmem:[%s224_s15 + $0x30] sm:$0xff] %v466_v3  ;;  %475 = vst [vmem:[%s224_s15 + $0x38] sm:$0xff] %v467_v5 }
 0x2cc PF: > { %s15_s18 = sadd.s32 1, %s591_s18  }
 0x2cd   : > { %p12_p4 = scmp.ge.s32.totalorder %s15_s18, 6  }
 0x2cf   :  { %14 = sbr.rel (!%p12_p4) target bundleno = 1 (0x1), region = 70 }

</bundles_post_ra>
